<compile_context>
chip_gen: v5e
topology: v5e:2x2
jax: 0.10.0
libtpu: 0.0.40
codegen_flags: <defaults>
</compile_context>

<pallas_src>
import jax
import jax.numpy as jnp
from jax.experimental import pallas as pl
from jax.experimental.pallas import tpu as pltpu

HIDDEN_SIZE = 64
INPUT_SIZE = 10
HID_PAD = 128  # lane-dense padded hidden width (keep at 128)


# --------------------------------------------------------------------------
# Loop-invariant parameter preparation (call once, NOT per step).
# --------------------------------------------------------------------------
def prepare_params(w_xh, w_hh, b_hh, hid_pad=HID_PAD):
    """Pre-transpose to [K, N] and zero-pad N (and the hidden K) to hid_pad.

    wx_pad: [input_size, hid_pad]   = pad(W_xh^T)
    wh_pad: [hid_pad,    hid_pad]   = pad(W_hh^T)  (padded rows are zero, so a
                                      padded hidden state contributes nothing)
    b_pad : [1, hid_pad]
    Padded output columns always evaluate to tanh(0 + 0) = 0, so the hidden
    state can safely be carried in its padded [B, hid_pad] layout.
    """
    hid, in_sz = w_xh.shape
    wx_pad = jnp.zeros((in_sz, hid_pad), w_xh.dtype).at[:, :hid].set(w_xh.T)
    wh_pad = jnp.zeros((hid_pad, hid_pad), w_hh.dtype).at[:hid, :hid].set(w_hh.T)
    b_pad = jnp.zeros((1, hid_pad), b_hh.dtype).at[0, :hid].set(b_hh)
    return wx_pad, wh_pad, b_pad


# --------------------------------------------------------------------------
# Single-step cell kernel (grid=(), everything resident in VMEM).
# --------------------------------------------------------------------------
def _rnn_cell_kernel(x_ref, h_ref, wx_ref, wh_ref, b_ref, out_ref):
    # Two MXU passes with weights already in [K, N] layout (no transpose),
    # f32 accumulation, lane-dense unmasked store of the padded hidden.
    acc = jnp.dot(x_ref[...], wx_ref[...], preferred_element_type=jnp.float32)
    acc = acc + jnp.dot(h_ref[...], wh_ref[...],
                        preferred_element_type=jnp.float32)
    out_ref[...] = jnp.tanh(acc + b_ref[...]).astype(out_ref.dtype)


def rnn_cell_step(x, hidden_padded, wx_pad, wh_pad, b_pad):
    """One cell step on an already-padded hidden state [B, hid_pad]."""
    B = x.shape[0]
    hid_pad = wh_pad.shape[1]
    return pl.pallas_call(
        _rnn_cell_kernel,
        out_shape=jax.ShapeDtypeStruct((B, hid_pad), x.dtype),
        in_specs=[pl.BlockSpec(memory_space=pltpu.MemorySpace.VMEM)] * 5,
        out_specs=pl.BlockSpec(memory_space=pltpu.MemorySpace.VMEM),
    )(x, hidden_padded, wx_pad, wh_pad, b_pad)


def rnn_layer_forward(x, hidden, wx_pad, wh_pad, b_pad):
    """Exact RNNLayer.forward semantics: unpadded hidden in / unpadded out.

    For recurrent drivers, prefer rnn_layer_forward_seq (or keep the hidden
    padded and call rnn_cell_step directly) to avoid per-step pad/slice.
    """
    B, hid = hidden.shape
    hid_pad = wh_pad.shape[1]
    h_pad = jnp.zeros((B, hid_pad), hidden.dtype).at[:, :hid].set(hidden)
    out_pad = rnn_cell_step(x, h_pad, wx_pad, wh_pad, b_pad)
    return out_pad[:, :hid]


# --------------------------------------------------------------------------
# Full recurrence inside ONE pallas_call: grid over T, hidden resident in
# VMEM as the output accumulator, weights/bias resident across all steps.
# --------------------------------------------------------------------------
def _rnn_seq_kernel(xs_ref, h0_ref, wx_ref, wh_ref, b_ref, h_ref):
    t = pl.program_id(0)

    @pl.when(t == 0)
    def _():
        h_ref[...] = h0_ref[...]  # initialize the resident accumulator

    acc = jnp.dot(xs_ref[0], wx_ref[...], preferred_element_type=jnp.float32)
    acc = acc + jnp.dot(h_ref[...], wh_ref[...],
                        preferred_element_type=jnp.float32)
    h_ref[...] = jnp.tanh(acc + b_ref[...]).astype(h_ref.dtype)


def rnn_layer_forward_seq(xs, hidden0, wx_pad, wh_pad, b_pad):
    """Apply the cell over xs[T, B, input_size]; returns final hidden [B, hid]."""
    T, B, in_sz = xs.shape
    hid = hidden0.shape[1]
    hid_pad = wh_pad.shape[1]
    h0_pad = jnp.zeros((B, hid_pad), hidden0.dtype).at[:, :hid].set(hidden0)

    h_final_pad = pl.pallas_call(
        _rnn_seq_kernel,
        out_shape=jax.ShapeDtypeStruct((B, hid_pad), xs.dtype),
        grid_spec=pltpu.PrefetchScalarGridSpec(
            num_scalar_prefetch=0,
            grid=(T,),
            in_specs=[
                # x_t streamed one timestep per grid iteration
                pl.BlockSpec((1, B, in_sz), lambda t: (t, 0, 0)),
                # h0 / weights / bias: constant block index -> resident in VMEM
                pl.BlockSpec((B, hid_pad), lambda t: (0, 0)),
                pl.BlockSpec((in_sz, hid_pad), lambda t: (0, 0)),
                pl.BlockSpec((hid_pad, hid_pad), lambda t: (0, 0)),
                pl.BlockSpec((1, hid_pad), lambda t: (0, 0)),
            ],
            # Output = carried hidden state; same block every step so it stays
            # resident and is written back to HBM once at the end.
            out_specs=pl.BlockSpec((B, hid_pad), lambda t: (0, 0)),
        ),
        compiler_params=pltpu.CompilerParams(
            dimension_semantics=("arbitrary",)),  # sequential recurrence
    )(xs, h0_pad, wx_pad, wh_pad, b_pad)

    return h_final_pad[:, :hid]


# --------------------------------------------------------------------------
# Pure-JAX reference (matches PyTorch semantics).
# --------------------------------------------------------------------------
def reference_forward(x, hidden, w_xh, w_hh, b_hh):
    return jnp.tanh(x @ w_xh.T + hidden @ w_hh.T + b_hh)


if __name__ == "__main__":
    key = jax.random.PRNGKey(0)
    k_x, k_h, k_wxh, k_whh, k_b, k_seq = jax.random.split(key, 6)

    batch = 8
    seq_len = 8

    # Deterministic parameter init (mimic PyTorch Linear uniform bounds).
    bound_xh = 1.0 / jnp.sqrt(jnp.float32(INPUT_SIZE))
    bound_hh = 1.0 / jnp.sqrt(jnp.float32(HIDDEN_SIZE))
    w_xh = jax.random.uniform(k_wxh, (HIDDEN_SIZE, INPUT_SIZE),
                              minval=-bound_xh, maxval=bound_xh,
                              dtype=jnp.float32)
    w_hh = jax.random.uniform(k_whh, (HIDDEN_SIZE, HIDDEN_SIZE),
                              minval=-bound_hh, maxval=bound_hh,
                              dtype=jnp.float32)
    b_hh = jax.random.uniform(k_b, (HIDDEN_SIZE,),
                              minval=-bound_hh, maxval=bound_hh,
                              dtype=jnp.float32)

    x = jax.random.normal(k_x, (batch, INPUT_SIZE), dtype=jnp.float32)
    hidden0 = jax.random.normal(k_h, (batch, HIDDEN_SIZE), dtype=jnp.float32)
    xs = jax.random.normal(k_seq, (seq_len, batch, INPUT_SIZE),
                           dtype=jnp.float32)

    # Hoisted, loop-invariant parameter prep (done ONCE).
    wx_pad, wh_pad, b_pad = jax.block_until_ready(
        prepare_params(w_xh, w_hh, b_hh))

    # ---- single-step cell: exact RNNLayer.forward semantics ----
    out = rnn_layer_forward(x, hidden0, wx_pad, wh_pad, b_pad)
    out = jax.block_until_ready(out)
    ref = reference_forward(x, hidden0, w_xh, w_hh, b_hh)
    assert out.shape == (batch, HIDDEN_SIZE)
    assert jnp.allclose(out, ref, atol=1e-5, rtol=1e-5), "single-step mismatch"

    # ---- full recurrence inside ONE pallas_call ----
    h_seq = rnn_layer_forward_seq(xs, hidden0, wx_pad, wh_pad, b_pad)
    h_seq = jax.block_until_ready(h_seq)

    def _ref_step(h, x_t):
        return reference_forward(x_t, h, w_xh, w_hh, b_hh), None

    h_ref, _ = jax.lax.scan(_ref_step, hidden0, xs)
    assert h_seq.shape == (batch, HIDDEN_SIZE)
    assert jnp.allclose(h_seq, h_ref, atol=1e-4, rtol=1e-4), "sequence mismatch"

    print("KERNEL_OK")
</pallas_src>

<mosaic_0001>
module attributes {stable_mosaic.version = 11 : i64} {
  func.func @_rnn_cell_kernel(%arg0: memref<8x10xf32, #tpu.memory_space<vmem>>, %arg1: memref<8x128xf32, #tpu.memory_space<vmem>>, %arg2: memref<10x128xf32, #tpu.memory_space<vmem>>, %arg3: memref<128x128xf32, #tpu.memory_space<vmem>>, %arg4: memref<1x128xf32, #tpu.memory_space<vmem>>, %arg5: memref<8x128xf32, #tpu.memory_space<vmem>>) attributes {dimension_semantics = [], scalar_prefetch = 0 : i64, scratch_operands = 0 : i64, tpu.core_type = #tpu.core_type<tc>} {
    %c0 = arith.constant 0 : index
    %c0_0 = arith.constant 0 : index
    %0 = vector.load %arg0[%c0, %c0_0] : memref<8x10xf32, #tpu.memory_space<vmem>>, vector<8x10xf32>
    %c0_1 = arith.constant 0 : index
    %c0_2 = arith.constant 0 : index
    %1 = vector.load %arg2[%c0_1, %c0_2] : memref<10x128xf32, #tpu.memory_space<vmem>>, vector<10x128xf32>
    %cst = arith.constant dense<0.000000e+00> : vector<8x128xf32>
    %2 = tpu.matmul %0, %1, %cst {dimension_numbers = #tpu.dot_dimension_numbers<[1], [0], [0], [1], [0, 0, 1, 1], [], []>} : vector<8x10xf32>, vector<10x128xf32>, vector<8x128xf32> -> vector<8x128xf32>
    %c0_3 = arith.constant 0 : index
    %c0_4 = arith.constant 0 : index
    %3 = vector.load %arg1[%c0_3, %c0_4] : memref<8x128xf32, #tpu.memory_space<vmem>>, vector<8x128xf32>
    %c0_5 = arith.constant 0 : index
    %c0_6 = arith.constant 0 : index
    %4 = vector.load %arg3[%c0_5, %c0_6] : memref<128x128xf32, #tpu.memory_space<vmem>>, vector<128x128xf32>
    %cst_7 = arith.constant dense<0.000000e+00> : vector<8x128xf32>
    %5 = tpu.matmul %3, %4, %cst_7 {dimension_numbers = #tpu.dot_dimension_numbers<[1], [0], [0], [1], [0, 0, 1, 1], [], []>} : vector<8x128xf32>, vector<128x128xf32>, vector<8x128xf32> -> vector<8x128xf32>
    %6 = arith.addf %2, %5 : vector<8x128xf32>
    %c0_8 = arith.constant 0 : index
    %c0_9 = arith.constant 0 : index
    %7 = vector.load %arg4[%c0_8, %c0_9] : memref<1x128xf32, #tpu.memory_space<vmem>>, vector<1x128xf32>
    %8 = vector.broadcast %7 : vector<1x128xf32> to vector<8x128xf32>
    %9 = arith.addf %6, %8 : vector<8x128xf32>
    %10 = math.tanh %9 : vector<8x128xf32>
    %c0_10 = arith.constant 0 : index
    %c0_11 = arith.constant 0 : index
    %11 = vector.load %arg5[%c0_10, %c0_11] : memref<8x128xf32, #tpu.memory_space<vmem>>, vector<8x128xf32>
    tpu.vector_store %arg5[%c0_10, %c0_11], %10 {strides = array<i32>} : memref<8x128xf32, #tpu.memory_space<vmem>>, vector<8x128xf32>,
    return
  }
}

</mosaic_0001>

<bundles_post_ra>
// kernel: tpu_custom_call.1
= control target key start
LH: loop header
LB: loop body
LE: loop exit
PB: predicated region body
PF: predicated region fallthrough
CT: control target
= control target key end

     0   :  { %10 = vsyncpa [#allocation3], 0  ;;  %s369_s0 = inlined_call_operand.hbm [shape: f32[8,10], index: 0, kind: input, shape index: {}]   ;;  %s370_s1 = inlined_call_operand.hbm [shape: f32[8,128], index: 1, kind: input, shape index: {}]   ;;  %s371_s2 = inlined_call_operand.hbm [shape: f32[10,128], index: 2, kind: input, shape index: {}]   ;;  %s372_s3 = inlined_call_operand.hbm [shape: f32[128,128], index: 3, kind: input, shape index: {}]   ;;  %s373_s4 = inlined_call_operand.vmem [shape: f32[1,128], index: 4, kind: input, shape index: {}]   ;;  %s374_s5 = inlined_call_operand.hbm [shape: f32[8,128], index: 5, kind: output, shape index: {}]  }
   0x1   :  { %11 = vsyncpa [#allocation6], 0 }
   0x2   :  { %12 = vsyncpa [#allocation9], 0  ;;  %s30_s20 = sshll.u32 %s370_s1, 4  ;;  %s31_s20 = int_to_ptr.hbm [resolvable:$true] %s30_s20 }
   0x3   :  { %13 = vsyncpa [#allocation4], 0  ;;  %s314_s21 = smov [#allocation5]   ;;  %s19_s25 = sshll.u32 %s369_s0, 4  ;;  %s20_s25 = int_to_ptr.hbm [resolvable:$true] %s19_s25 }
   0x4   :  { %s32_s22 = sshll.u32 %s314_s21, 4  ;;  %s315_s26 = smov [#allocation2]   ;;  %s33_s22 = int_to_ptr.vmem [resolvable:$true] %s32_s22 }
   0x5   :  { %35 = dma.hbm_to_vmem [thread:$0]  %s31_s20, 128, %s33_s22, [#allocation6]  }
   0x6   :  { %s21_s27 = sshll.u32 %s315_s26, 4  ;;  %s40_s30 = sshll.u32 %s371_s2, 4  ;;  %s22_s27 = int_to_ptr.vmem [resolvable:$true] %s21_s27  ;;  %s41_s30 = int_to_ptr.hbm [resolvable:$true] %s40_s30 }
   0x7   :  { %24 = dma.hbm_to_vmem [thread:$0]  %s20_s25, 128, %s22_s27, [#allocation3]  }
   0x8   :  { %s316_s1 = smov [#allocation7]   ;;  %s53_s9 = sshll.u32 %s372_s3, 4  ;;  %s54_s9 = int_to_ptr.hbm [resolvable:$true] %s53_s9 }
   0x9   :  { %s42_s6 = sshll.u32 %s316_s1, 4  ;;  %s317_s10 = smov 128   ;;  %s43_s6 = int_to_ptr.vmem [resolvable:$true] %s42_s6 }
   0xa   :  { %s318_s0 = smov 8   ;;  %s319_s11 = smov [#allocation8]  }
   0xb   :  { %48 = dma.hbm_to_vmem [thread:$0]  %s41_s30, 256, %s43_s6, [#allocation6], %s317_s10, %s317_s10, %s318_s0  }
   0xc   :  { %s55_s12 = sshll.u32 %s319_s11, 4  ;;  %s56_s12 = int_to_ptr.vmem [resolvable:$true] %s55_s12 }
   0xd   :  { %61 = dma.hbm_to_vmem [thread:$0]  %s54_s9, 2048, %s56_s12, [#allocation9], %s317_s10, %s317_s10, %s318_s0  }
   0xe   :  { %306 = dma.done.wait [#allocation3], 128  }
   0xf   :  { %307 = vsyncadd [#allocation3], 4294967168 }
  0x10   :  { %308 = dma.done.wait [#allocation6], 384  }
  0x11   :  { %309 = vsyncadd [#allocation6], 4294966912 }
  0x12   :  { %310 = dma.done.wait [#allocation9], 2048  }
  0x13   :  { %311 = vsyncadd [#allocation9], 4294965248  ;;  %v99_v0 = vld [vmem:[#allocation8 + $0x78] sm:$0xff]  ;;  %v98_v1 = vld [vmem:[#allocation8 + $0x70] sm:$0xff]  ;;  %vm124_vm0 = vcmask 1041408   ;;  %vm120_vm1 = vcmask 80896  }
  0x14   :  { %100 = vmatpush.msra.mxu0 %v99_v0  ;;  %v97_v2 = vld [vmem:[#allocation8 + $0x68] sm:$0xff]  ;;  %v96_v3 = vld [vmem:[#allocation8 + $0x60] sm:$0xff]  ;;  %v82_v4 = vld [vmem:[#allocation7 + $0x8] sm:$0x3]  ;;  %s320_s13 = smov [#allocation10]   ;;  %s162_s17 = sshll.u32 %s374_s5, 4  ;;  %s163_s17 = int_to_ptr.hbm [resolvable:$true] %s162_s17 }
  0x15   :  { %v81_v5 = vld [vmem:[#allocation7] sm:$0xff]  ;;  %v95_v6 = vld [vmem:[#allocation8 + $0x58] sm:$0xff]  ;;  %174 = vmatpush.msk.msra.mxu1 %vm124_vm0, %v82_v4  ;;  %v80_v7 = vld [vmem:[#allocation2] sm:$0xff]  ;;  %s160_s14 = sshll.u32 %s320_s13, 4  ;;  %s161_s14 = int_to_ptr.vmem [resolvable:$true] %s160_s14 }
  0x16   :  { %101 = vmatpush.msra.mxu0 %v98_v1  ;;  %v94_v8 = vld [vmem:[#allocation8 + $0x50] sm:$0xff]  ;;  %v93_v9 = vld [vmem:[#allocation8 + $0x48] sm:$0xff]  ;;  %v92_v10 = vld [vmem:[#allocation8 + $0x40] sm:$0xff] }
  0x17   :  { %143 = vmatpush.msra.mxu1 %v81_v5  ;;  %v91_v11 = vld [vmem:[#allocation8 + $0x38] sm:$0xff]  ;;  %v90_v12 = vld [vmem:[#allocation8 + $0x30] sm:$0xff]  ;;  %v89_v13 = vld [vmem:[#allocation8 + $0x28] sm:$0xff] }
  0x18   :  { %102 = vmatpush.msra.mxu0 %v97_v2  ;;  %175 = vmatmul.msk.f32.vlgmr.msra.gmra.mxu1 %vm120_vm1, %v80_v7  ;;  %v88_v14 = vld [vmem:[#allocation8 + $0x20] sm:$0xff]  ;;  %v87_v15 = vld [vmem:[#allocation8 + $0x18] sm:$0xff]  ;;  %v86_v16 = vld [vmem:[#allocation8 + $0x10] sm:$0xff] }
  0x19   :  { %v85_v17 = vld [vmem:[#allocation8 + $0x8] sm:$0xff]  ;;  %v84_v18 = vld [vmem:[#allocation8] sm:$0xff] }
  0x1a   :  { %103 = vmatpush.msra.mxu0 %v96_v3  ;;  %v83_v19 = vld [vmem:[#allocation5] sm:$0xff]  ;;  %v183_v21 = vld [vmem:[%s373_s4] ss:$0 sm:$0xff] }
  0x1c   :  { %104 = vmatpush.msra.mxu0 %v95_v6 }
  0x1e   :  { %105 = vmatpush.msra.mxu0 %v94_v8 }
  0x20   :  { %106 = vmatpush.msra.mxu0 %v93_v9 }
  0x22   :  { %107 = vmatpush.msra.mxu0 %v92_v10 }
  0x24   :  { %108 = vmatpush.msra.mxu0 %v91_v11 }
  0x26   :  { %109 = vmatpush.msra.mxu0 %v90_v12 }
  0x28   :  { %110 = vmatpush.msra.mxu0 %v89_v13 }
  0x2a   :  { %111 = vmatpush.msra.mxu0 %v88_v14 }
  0x2c   :  { %112 = vmatpush.msra.mxu0 %v87_v15 }
  0x2e   :  { %113 = vmatpush.msra.mxu0 %v86_v16 }
  0x30   :  { %114 = vmatpush.msra.mxu0 %v85_v17 }
  0x32   :  { %115 = vmatpush.msra.mxu0 %v84_v18 }
  0x33   :  { %116 = vmatmul.f32.vlgmr.msra.gmra.mxu0 %v83_v19 }
  0x95   :  { %v145_v20 = vpop.f32.mrf.mxu1 }
  0xb0   :  { %v117_v22 = vpop.f32.mrf.mxu0 }
  0xb1   :  { %v146_v23 = vadd.f32 %v145_v20, %v117_v22 }
  0xb3   :  { %v152_v24 = vadd.f32 %v183_v21, %v146_v23 }
  0xb5   :  { %184 = vtanh.f32 %v152_v24 }
  0xbb   :  { %v185_v25 = vpop.eup %184 }
  0xbc   :  { %154 = vst [vmem:[#allocation10] sm:$0xff] %v185_v25 }
  0xbd   :  { %165 = dma.vmem_to_hbm [thread:$0]  %s161_s14, 128, %s163_s17, [#allocation4]  }
  0xbe   :  { %312 = dma.done.wait [#allocation4], 128  }
  0xbf   :  { %313 = vsyncadd [#allocation4], 4294967168 }
  0xc0   :  { %170 = vsyncpa [#allocation3], 1 }
  0xc1   :  { %171 = vsyncpa [#allocation6], 1 }
  0xc2   :  { %172 = vsyncpa [#allocation9], 1 }
  0xc3   :  { %173 = vsyncpa [#allocation4], 1 }

</bundles_post_ra>
